<compile_context>
chip_gen: v5e
topology: v5e:2x2
jax: 0.10.0
libtpu: 0.0.40
codegen_flags: <defaults>
</compile_context>

<pallas_src>
import functools

import numpy as np
import jax
import jax.numpy as jnp
from jax.experimental import pallas as pl
from jax.experimental.pallas import tpu as pltpu


# --------------------------------------------------------------------------- #
# Kernel
# --------------------------------------------------------------------------- #
def _scm_kernel(x_ref, vec_ref, w1_ref, w2_ref, b3_ref, out_ref,
                *, phase_scalar, limit, eps, phase_dtype):
    x = x_ref[...].astype(jnp.float32)

    # Packed parameter vectors: rows = [g1, be1, b1, b2, g2, be2, w3, pad]
    vecs = vec_ref[...]                       # (8, D) f32, loaded once per step
    g1, be1 = vecs[0:1], vecs[1:2]
    b1, b2 = vecs[2:3], vecs[3:4]
    g2, be2 = vecs[4:5], vecs[5:6]
    w3 = vecs[6:7]

    # ---- LayerNorm #1 (single-pass stats: var = E[x^2] - mu^2) ----
    mu = jnp.mean(x, axis=-1, keepdims=True)
    var = jnp.mean(x * x, axis=-1, keepdims=True) - mu * mu
    xn = (x - mu) * jax.lax.rsqrt(var + eps) * g1 + be1

    # ---- Linear #1 (weights pre-transposed to (in, out); bf16 on the MXU) ----
    w1 = w1_ref[...]
    h = jnp.dot(xn.astype(w1.dtype), w1,
                preferred_element_type=jnp.float32) + b1

    # ---- PhaseModulator 'sin': factor in phase_dtype (bf16 on v6e/v7x EUP) ----
    hp = h.astype(phase_dtype)
    factor = jnp.sin(jax.nn.sigmoid(hp * phase_scalar) * (jnp.pi / 2.0))
    h = h * factor.astype(jnp.float32)

    # ---- Linear #2 ----
    w2 = w2_ref[...]
    expr = jnp.dot(h.astype(w2.dtype), w2,
                   preferred_element_type=jnp.float32) + b2

    # ---- project: LayerNorm #2 -> Linear(D, 1) -> sigmoid -> clamp(max=limit) ----
    mu2 = jnp.mean(expr, axis=-1, keepdims=True)
    var2 = jnp.mean(expr * expr, axis=-1, keepdims=True) - mu2 * mu2
    en = (expr - mu2) * jax.lax.rsqrt(var2 + eps) * g2 + be2

    logit = jnp.sum(en * w3, axis=-1, keepdims=True) + b3_ref[0, 0]
    gate = jnp.minimum(jax.nn.sigmoid(logit), limit)

    out_ref[...] = (expr * gate).astype(out_ref.dtype)


# --------------------------------------------------------------------------- #
# Helpers
# --------------------------------------------------------------------------- #
def _round_up(a, b):
    return -(-a // b) * b


def _const_spec(block_shape, buffer_count=None):
    """Broadcast spec (same block every grid step); optionally single-buffered."""
    index_map = lambda i: (0,) * len(block_shape)
    if buffer_count is not None:
        try:
            return pl.BlockSpec(block_shape, index_map,
                                pipeline_mode=pl.Buffered(buffer_count))
        except (AttributeError, TypeError):
            pass  # fall back to default double-buffering on older jax
    return pl.BlockSpec(block_shape, index_map)


def _phase_dtype():
    """bf16 EUP on v6e/v7x; f32 elsewhere (v5e has no bf16 VPU/EUP)."""
    try:
        kind = jax.devices()[0].device_kind.lower()
    except Exception:
        return jnp.float32
    if any(tag in kind for tag in ("v6", "v7", "7x")):
        return jnp.bfloat16
    return jnp.float32


def _pick_tile_and_vmem(M, D, x_bytes, w_bytes, target_rows):
    """Pick the row tile from the per-generation VMEM budget; return (rt, limit)."""
    cap = 128 << 20                                  # v5e / v6e physical VMEM
    try:
        cap = int(pltpu.get_tpu_info().vmem_capacity_bytes)   # 64 MiB on v7x
    except Exception:
        pass
    usable = int(cap * 0.85)
    weights = 2 * D * D * w_bytes                    # two resident (D,D) weights (Buffered(1))
    vecs = 8 * D * 4                                 # packed parameter vectors (Buffered(1))
    headroom = 8 << 20
    # double-buffered x/out tiles + ~6 live f32 intermediates (x, xn, h, phase, expr, en)
    per_row = 4 * D * x_bytes + 6 * D * 4
    target = max(8, (int(target_rows) // 8) * 8)
    avail = usable - weights - vecs - headroom
    if avail <= per_row * 8:
        # TODO(synk): K-tile the (D, D) weights (K grid axis marked 'arbitrary' with
        #             the f32 accumulator) -- required on v7x (64 MiB VMEM) once
        #             D >~ 2800; until then fall back to the minimum row tile.
        rt = 8
    else:
        rt = max(8, min(target, (avail // per_row) // 8 * 8))
    rt = int(min(rt, _round_up(M, 8)))
    need = weights + vecs + headroom + rt * per_row
    return rt, int(max(16 << 20, min(need, cap)))


# --------------------------------------------------------------------------- #
# Wrapper
# --------------------------------------------------------------------------- #
def symbolic_conductance_modulator(x, prepared_params, *, phase_scalar=1.0,
                                   conductance_limit=1.0, eps=1e-5,
                                   row_tile=1024):
    """x: (..., D). prepared_params from prepare_params(). Returns x's shape/dtype."""
    vec_pack, w1t, w2t, b3 = prepared_params
    orig_shape = x.shape
    D = orig_shape[-1]
    xm = x.reshape(-1, D)
    M = xm.shape[0]

    rt, vmem_limit = _pick_tile_and_vmem(M, D, x.dtype.itemsize,
                                         w1t.dtype.itemsize, row_tile)

    # TODO(synk): for D < 128 the output last dim is not lane-dense (masked
    #             vst.msk partial stores); a row-folding layout pack would be
    #             needed if tiny D is a production shape.
    # TODO(synk): on v7x, confirm the single "parallel" row axis is sharded
    #             across both TensorCores; otherwise switch to pltpu.CORE_PARALLEL.
    row_spec = pl.BlockSpec((rt, D), lambda i: (i, 0))
    vec_spec = _const_spec((8, D), buffer_count=1)     # packed LN/bias/w3 vectors
    mat_spec = _const_spec((D, D), buffer_count=1)     # constant across grid: 1 buffer
    b3_spec = pl.BlockSpec(memory_space=pltpu.MemorySpace.SMEM)  # scalar gate bias

    kernel = functools.partial(_scm_kernel, phase_scalar=phase_scalar,
                               limit=conductance_limit, eps=eps,
                               phase_dtype=_phase_dtype())

    out = pl.pallas_call(
        kernel,
        out_shape=jax.ShapeDtypeStruct((M, D), x.dtype),
        grid_spec=pltpu.PrefetchScalarGridSpec(
            num_scalar_prefetch=0,
            grid=(pl.cdiv(M, rt),),        # ragged last block handled by the pipeline
            in_specs=[row_spec,            # x rows
                      vec_spec,            # packed (8, D): g1, be1, b1, b2, g2, be2, w3
                      mat_spec,            # W1^T (bf16)
                      mat_spec,            # W2^T (bf16)
                      b3_spec],            # b3 (1, 1) scalar in SMEM
            out_specs=row_spec,
        ),
        compiler_params=pltpu.CompilerParams(
            dimension_semantics=("parallel",),
            vmem_limit_bytes=vmem_limit),
    )(xm, vec_pack, w1t, w2t, b3)

    return out.reshape(orig_shape)


# --------------------------------------------------------------------------- #
# Parameters / reference
# --------------------------------------------------------------------------- #
def init_params(key, D, dtype=jnp.float32):
    """Deterministic synthetic parameters matching the nn.Module shapes (raw f32)."""
    k1, k2, k3, k4, k5, k6 = jax.random.split(key, 6)
    bound = 1.0 / (D ** 0.5)
    # nn.Linear weights are (out, in); we store them transposed (in, out).
    w1t = jax.random.uniform(k1, (D, D), dtype, -bound, bound)
    b1 = jax.random.uniform(k2, (1, D), dtype, -bound, bound)
    w2t = jax.random.uniform(k3, (D, D), dtype, -bound, bound)
    b2 = jax.random.uniform(k4, (1, D), dtype, -bound, bound)
    w3 = jax.random.uniform(k5, (1, D), dtype, -bound, bound)   # Linear(D, 1) weight
    b3 = jax.random.uniform(k6, (1, 1), dtype, -bound, bound)
    g1 = jnp.ones((1, D), dtype)
    be1 = jnp.zeros((1, D), dtype)
    g2 = jnp.ones((1, D), dtype)
    be2 = jnp.zeros((1, D), dtype)
    return (g1, be1, w1t, b1, w2t, b2, g2, be2, w3, b3)


def prepare_params(raw_params, matmul_dtype=jnp.bfloat16):
    """One-time prep: cast weights to bf16, pack the (1, D) vectors into (8, D)."""
    (g1, be1, w1t, b1, w2t, b2, g2, be2, w3, b3) = raw_params
    vec_pack = jnp.concatenate(
        [g1, be1, b1, b2, g2, be2, w3, jnp.zeros_like(g1)],
        axis=0).astype(jnp.float32)                       # (8, D)
    return (vec_pack,
            w1t.astype(matmul_dtype),
            w2t.astype(matmul_dtype),
            b3.astype(jnp.float32).reshape(1, 1))


def reference_forward(x, raw_params, *, phase_scalar=1.0, conductance_limit=1.0,
                      eps=1e-5, matmul_dtype=jnp.bfloat16,
                      phase_dtype=jnp.float32):
    """Pure-JAX reference mirroring the kernel's precision contract."""
    (g1, be1, w1t, b1, w2t, b2, g2, be2, w3, b3) = raw_params

    def ln(v, g, b):
        mu = jnp.mean(v, -1, keepdims=True)
        var = jnp.mean((v - mu) ** 2, -1, keepdims=True)
        return (v - mu) * jax.lax.rsqrt(var + eps) * g + b

    xf = x.astype(jnp.float32)
    xn = ln(xf, g1[0], be1[0])
    h = jnp.dot(xn.astype(matmul_dtype), w1t.astype(matmul_dtype),
                preferred_element_type=jnp.float32) + b1[0]
    hp = h.astype(phase_dtype)
    factor = jnp.sin(jax.nn.sigmoid(hp * phase_scalar) * (jnp.pi / 2.0))
    h = h * factor.astype(jnp.float32)
    expr = jnp.dot(h.astype(matmul_dtype), w2t.astype(matmul_dtype),
                   preferred_element_type=jnp.float32) + b2[0]
    en = ln(expr, g2[0], be2[0])
    logit = jnp.sum(en * w3[0], -1, keepdims=True) + b3[0, 0]
    gate = jnp.minimum(jax.nn.sigmoid(logit), conductance_limit)
    return (expr * gate).astype(x.dtype)


if __name__ == "__main__":
    key = jax.random.PRNGKey(0)
    kx, kp = jax.random.split(key)

    B, S, D = 2, 8, 32                 # input_dim = 32
    x = jax.random.normal(kx, (B, S, D), jnp.float32)
    raw_params = init_params(kp, D)
    params = prepare_params(raw_params)   # weights cast to bf16 ONCE, vectors packed

    out = symbolic_conductance_modulator(x, params,
                                         phase_scalar=1.0,
                                         conductance_limit=1.0)
    out = jax.block_until_ready(out)

    ref = reference_forward(x, raw_params, phase_dtype=_phase_dtype())
    assert out.shape == x.shape and out.dtype == x.dtype
    assert jnp.allclose(out, ref, atol=5e-3, rtol=5e-3), "mismatch vs JAX reference"

    print("KERNEL_OK")
</pallas_src>

<mosaic_0001>
module attributes {stable_mosaic.version = 11 : i64} {
  func.func @_scm_kernel(%arg0: i32, %arg1: memref<16x32xf32, #tpu.memory_space<vmem>>, %arg2: memref<8x32xf32, #tpu.memory_space<vmem>>, %arg3: memref<32x32xbf16, #tpu.memory_space<vmem>>, %arg4: memref<32x32xbf16, #tpu.memory_space<vmem>>, %arg5: memref<1x1xf32, #tpu.memory_space<smem>>, %arg6: memref<16x32xf32, #tpu.memory_space<vmem>>) attributes {dimension_semantics = [#tpu.dimension_semantics<parallel>], iteration_bounds = array<i64: 1>, scalar_prefetch = 0 : i64, scratch_operands = 0 : i64, tpu.core_type = #tpu.core_type<tc>, window_params = [{transform_indices = @transform_0, window_bounds = array<i64: 16, 32>}, {pipeline_mode = #tpu.pipeline_mode<synchronous>, transform_indices = @transform_1, window_bounds = array<i64: 8, 32>}, {pipeline_mode = #tpu.pipeline_mode<synchronous>, transform_indices = @transform_2, window_bounds = array<i64: 32, 32>}, {pipeline_mode = #tpu.pipeline_mode<synchronous>, transform_indices = @transform_3, window_bounds = array<i64: 32, 32>}, {transform_indices = @transform_4, window_bounds = array<i64: 1, 1>}, {transform_indices = @transform_5, window_bounds = array<i64: 16, 32>}]} {
    %c0 = arith.constant 0 : index
    %c0_0 = arith.constant 0 : index
    %0 = vector.load %arg1[%c0, %c0_0] : memref<16x32xf32, #tpu.memory_space<vmem>>, vector<16x32xf32>
    %c0_1 = arith.constant 0 : index
    %c0_2 = arith.constant 0 : index
    %1 = vector.load %arg2[%c0_1, %c0_2] : memref<8x32xf32, #tpu.memory_space<vmem>>, vector<8x32xf32>
    %2 = vector.extract_strided_slice %1 {offsets = [0, 0], sizes = [1, 32], strides = [1, 1]} : vector<8x32xf32> to vector<1x32xf32>
    %3 = vector.extract_strided_slice %1 {offsets = [1, 0], sizes = [1, 32], strides = [1, 1]} : vector<8x32xf32> to vector<1x32xf32>
    %4 = vector.extract_strided_slice %1 {offsets = [2, 0], sizes = [1, 32], strides = [1, 1]} : vector<8x32xf32> to vector<1x32xf32>
    %5 = vector.extract_strided_slice %1 {offsets = [3, 0], sizes = [1, 32], strides = [1, 1]} : vector<8x32xf32> to vector<1x32xf32>
    %6 = vector.extract_strided_slice %1 {offsets = [4, 0], sizes = [1, 32], strides = [1, 1]} : vector<8x32xf32> to vector<1x32xf32>
    %7 = vector.extract_strided_slice %1 {offsets = [5, 0], sizes = [1, 32], strides = [1, 1]} : vector<8x32xf32> to vector<1x32xf32>
    %8 = vector.extract_strided_slice %1 {offsets = [6, 0], sizes = [1, 32], strides = [1, 1]} : vector<8x32xf32> to vector<1x32xf32>
    %cst = arith.constant dense<0.000000e+00> : vector<16xf32>
    %9 = vector.multi_reduction <add>, %0, %cst [1] : vector<16x32xf32> to vector<16xf32>
    %10 = vector.shape_cast %9 : vector<16xf32> to vector<16x1xf32>
    %cst_3 = arith.constant 3.200000e+01 : f32
    %11 = vector.broadcast %cst_3 : f32 to vector<16x1xf32>
    %12 = arith.divf %10, %11 : vector<16x1xf32>
    %13 = arith.mulf %0, %0 : vector<16x32xf32>
    %cst_4 = arith.constant dense<0.000000e+00> : vector<16xf32>
    %14 = vector.multi_reduction <add>, %13, %cst_4 [1] : vector<16x32xf32> to vector<16xf32>
    %15 = vector.shape_cast %14 : vector<16xf32> to vector<16x1xf32>
    %cst_5 = arith.constant 3.200000e+01 : f32
    %16 = vector.broadcast %cst_5 : f32 to vector<16x1xf32>
    %17 = arith.divf %15, %16 : vector<16x1xf32>
    %18 = arith.mulf %12, %12 : vector<16x1xf32>
    %19 = arith.subf %17, %18 : vector<16x1xf32>
    %20 = vector.broadcast %12 : vector<16x1xf32> to vector<16x32xf32>
    %21 = arith.subf %0, %20 : vector<16x32xf32>
    %cst_6 = arith.constant 9.99999974E-6 : f32
    %22 = vector.broadcast %cst_6 : f32 to vector<16x1xf32>
    %23 = arith.addf %19, %22 : vector<16x1xf32>
    %24 = math.rsqrt %23 : vector<16x1xf32>
    %25 = vector.broadcast %24 : vector<16x1xf32> to vector<16x32xf32>
    %26 = arith.mulf %21, %25 : vector<16x32xf32>
    %27 = vector.broadcast %2 : vector<1x32xf32> to vector<16x32xf32>
    %28 = arith.mulf %26, %27 : vector<16x32xf32>
    %29 = vector.broadcast %3 : vector<1x32xf32> to vector<16x32xf32>
    %30 = arith.addf %28, %29 : vector<16x32xf32>
    %c0_7 = arith.constant 0 : index
    %c0_8 = arith.constant 0 : index
    %31 = vector.load %arg3[%c0_7, %c0_8] : memref<32x32xbf16, #tpu.memory_space<vmem>>, vector<32x32xbf16>
    %32 = arith.truncf %30 : vector<16x32xf32> to vector<16x32xbf16>
    %cst_9 = arith.constant dense<0.000000e+00> : vector<16x32xf32>
    %33 = tpu.matmul %32, %31, %cst_9 {dimension_numbers = #tpu.dot_dimension_numbers<[1], [0], [0], [1], [0, 0, 1, 1], [], []>} : vector<16x32xbf16>, vector<32x32xbf16>, vector<16x32xf32> -> vector<16x32xf32>
    %34 = vector.broadcast %4 : vector<1x32xf32> to vector<16x32xf32>
    %35 = arith.addf %33, %34 : vector<16x32xf32>
    %cst_10 = arith.constant 1.000000e+00 : f32
    %36 = vector.broadcast %cst_10 : f32 to vector<16x32xf32>
    %37 = arith.mulf %35, %36 : vector<16x32xf32>
    %38 = arith.negf %37 : vector<16x32xf32>
    %39 = math.exp %38 : vector<16x32xf32>
    %cst_11 = arith.constant 1.000000e+00 : f32
    %40 = vector.broadcast %cst_11 : f32 to vector<16x32xf32>
    %41 = arith.addf %40, %39 : vector<16x32xf32>
    %42 = arith.divf %40, %41 : vector<16x32xf32>
    %cst_12 = arith.constant 1.57079637 : f32
    %43 = vector.broadcast %cst_12 : f32 to vector<16x32xf32>
    %44 = arith.mulf %42, %43 : vector<16x32xf32>
    %45 = math.sin %44 : vector<16x32xf32>
    %46 = arith.mulf %35, %45 : vector<16x32xf32>
    %c0_13 = arith.constant 0 : index
    %c0_14 = arith.constant 0 : index
    %47 = vector.load %arg4[%c0_13, %c0_14] : memref<32x32xbf16, #tpu.memory_space<vmem>>, vector<32x32xbf16>
    %48 = arith.truncf %46 : vector<16x32xf32> to vector<16x32xbf16>
    %cst_15 = arith.constant dense<0.000000e+00> : vector<16x32xf32>
    %49 = tpu.matmul %48, %47, %cst_15 {dimension_numbers = #tpu.dot_dimension_numbers<[1], [0], [0], [1], [0, 0, 1, 1], [], []>} : vector<16x32xbf16>, vector<32x32xbf16>, vector<16x32xf32> -> vector<16x32xf32>
    %50 = vector.broadcast %5 : vector<1x32xf32> to vector<16x32xf32>
    %51 = arith.addf %49, %50 : vector<16x32xf32>
    %cst_16 = arith.constant dense<0.000000e+00> : vector<16xf32>
    %52 = vector.multi_reduction <add>, %51, %cst_16 [1] : vector<16x32xf32> to vector<16xf32>
    %53 = vector.shape_cast %52 : vector<16xf32> to vector<16x1xf32>
    %cst_17 = arith.constant 3.200000e+01 : f32
    %54 = vector.broadcast %cst_17 : f32 to vector<16x1xf32>
    %55 = arith.divf %53, %54 : vector<16x1xf32>
    %56 = arith.mulf %51, %51 : vector<16x32xf32>
    %cst_18 = arith.constant dense<0.000000e+00> : vector<16xf32>
    %57 = vector.multi_reduction <add>, %56, %cst_18 [1] : vector<16x32xf32> to vector<16xf32>
    %58 = vector.shape_cast %57 : vector<16xf32> to vector<16x1xf32>
    %cst_19 = arith.constant 3.200000e+01 : f32
    %59 = vector.broadcast %cst_19 : f32 to vector<16x1xf32>
    %60 = arith.divf %58, %59 : vector<16x1xf32>
    %61 = arith.mulf %55, %55 : vector<16x1xf32>
    %62 = arith.subf %60, %61 : vector<16x1xf32>
    %63 = vector.broadcast %55 : vector<16x1xf32> to vector<16x32xf32>
    %64 = arith.subf %51, %63 : vector<16x32xf32>
    %cst_20 = arith.constant 9.99999974E-6 : f32
    %65 = vector.broadcast %cst_20 : f32 to vector<16x1xf32>
    %66 = arith.addf %62, %65 : vector<16x1xf32>
    %67 = math.rsqrt %66 : vector<16x1xf32>
    %68 = vector.broadcast %67 : vector<16x1xf32> to vector<16x32xf32>
    %69 = arith.mulf %64, %68 : vector<16x32xf32>
    %70 = vector.broadcast %6 : vector<1x32xf32> to vector<16x32xf32>
    %71 = arith.mulf %69, %70 : vector<16x32xf32>
    %72 = vector.broadcast %7 : vector<1x32xf32> to vector<16x32xf32>
    %73 = arith.addf %71, %72 : vector<16x32xf32>
    %74 = vector.broadcast %8 : vector<1x32xf32> to vector<16x32xf32>
    %75 = arith.mulf %73, %74 : vector<16x32xf32>
    %cst_21 = arith.constant dense<0.000000e+00> : vector<16xf32>
    %76 = vector.multi_reduction <add>, %75, %cst_21 [1] : vector<16x32xf32> to vector<16xf32>
    %77 = vector.shape_cast %76 : vector<16xf32> to vector<16x1xf32>
    %c0_22 = arith.constant 0 : index
    %c0_23 = arith.constant 0 : index
    %78 = memref.load %arg5[%c0_22, %c0_23] : memref<1x1xf32, #tpu.memory_space<smem>>
    %79 = vector.broadcast %78 : f32 to vector<16x1xf32>
    %80 = arith.addf %77, %79 : vector<16x1xf32>
    %81 = arith.negf %80 : vector<16x1xf32>
    %82 = math.exp %81 : vector<16x1xf32>
    %cst_24 = arith.constant 1.000000e+00 : f32
    %83 = vector.broadcast %cst_24 : f32 to vector<16x1xf32>
    %84 = arith.addf %83, %82 : vector<16x1xf32>
    %85 = arith.divf %83, %84 : vector<16x1xf32>
    %cst_25 = arith.constant 1.000000e+00 : f32
    %86 = vector.broadcast %cst_25 : f32 to vector<16x1xf32>
    %87 = arith.minimumf %85, %86 : vector<16x1xf32>
    %88 = vector.broadcast %87 : vector<16x1xf32> to vector<16x32xf32>
    %89 = arith.mulf %51, %88 : vector<16x32xf32>
    %c0_26 = arith.constant 0 : index
    %c0_27 = arith.constant 0 : index
    %90 = vector.load %arg6[%c0_26, %c0_27] : memref<16x32xf32, #tpu.memory_space<vmem>>, vector<16x32xf32>
    tpu.vector_store %arg6[%c0_26, %c0_27], %89 {strides = array<i32>} : memref<16x32xf32, #tpu.memory_space<vmem>>, vector<16x32xf32>,
    return
  }
  func.func @transform_0(%arg0: i32) -> (i32, i32) {
    %c0_i32 = arith.constant 0 : i32
    %c0_i32_0 = arith.constant 0 : i32
    return %arg0, %c0_i32 : i32, i32
  }
  func.func @transform_1(%arg0: i32) -> (i32, i32) {
    %c0_i32 = arith.constant 0 : i32
    %c0_i32_0 = arith.constant 0 : i32
    %c0_i32_1 = arith.constant 0 : i32
    return %c0_i32, %c0_i32_0 : i32, i32
  }
  func.func @transform_2(%arg0: i32) -> (i32, i32) {
    %c0_i32 = arith.constant 0 : i32
    %c0_i32_0 = arith.constant 0 : i32
    %c0_i32_1 = arith.constant 0 : i32
    return %c0_i32, %c0_i32_0 : i32, i32
  }
  func.func @transform_3(%arg0: i32) -> (i32, i32) {
    %c0_i32 = arith.constant 0 : i32
    %c0_i32_0 = arith.constant 0 : i32
    %c0_i32_1 = arith.constant 0 : i32
    return %c0_i32, %c0_i32_0 : i32, i32
  }
  func.func @transform_4(%arg0: i32) -> (i32, i32) {
    %c0_i32 = arith.constant 0 : i32
    %c0_i32_0 = arith.constant 0 : i32
    %c0_i32_1 = arith.constant 0 : i32
    return %c0_i32, %c0_i32_0 : i32, i32
  }
  func.func @transform_5(%arg0: i32) -> (i32, i32) {
    %c0_i32 = arith.constant 0 : i32
    %c0_i32_0 = arith.constant 0 : i32
    return %arg0, %c0_i32 : i32, i32
  }
}

</mosaic_0001>

<bundles_post_ra>
// kernel: tpu_custom_call.1
= control target key start
LH: loop header
LB: loop body
LE: loop exit
PB: predicated region body
PF: predicated region fallthrough
CT: control target
= control target key end

     0   :  { %11 = vsyncpa [#allocation4], 0  ;;  %s1186_s0 = inlined_call_operand.hbm [shape: f32[16,32], index: 0, kind: input, shape index: {}]   ;;  %s1187_s1 = inlined_call_operand.hbm [shape: f32[8,32], index: 1, kind: input, shape index: {}]   ;;  %s1188_s2 = inlined_call_operand.hbm [shape: bf16[32,32], index: 2, kind: input, shape index: {}]   ;;  %s1189_s3 = inlined_call_operand.hbm [shape: bf16[32,32], index: 3, kind: input, shape index: {}]   ;;  %s1190_s4 = inlined_call_operand.<no memory space> [shape: f32[1,1], index: 4, kind: input, shape index: {}]   ;;  %s1191_s5 = inlined_call_operand.hbm [shape: f32[16,32], index: 5, kind: output, shape index: {}]  }
   0x1   :  { %12 = vsyncpa [#allocation7], 0 }
   0x2   :  { %13 = vsyncpa [#allocation10], 0  ;;  %s33_s20 = sshll.u32 %s1187_s1, 4  ;;  %s34_s20 = int_to_ptr.hbm [resolvable:$true] %s33_s20 }
   0x3   :  { %14 = vsyncpa [#allocation5], 0  ;;  %s906_s21 = smov [#allocation6]   ;;  %s19_s25 = sshll.u32 %s1186_s0, 4  ;;  %s20_s25 = int_to_ptr.hbm [resolvable:$true] %s19_s25 }
   0x4   :  { %s35_s22 = sshll.u32 %s906_s21, 4  ;;  %s907_s26 = smov [#allocation3]   ;;  %s36_s22 = int_to_ptr.vmem [resolvable:$true] %s35_s22 }
   0x5   :  { %38 = dma.hbm_to_vmem [thread:$0]  %s34_s20, 128, %s36_s22, [#allocation7]  }
   0x6   :  { %s21_s27 = sshll.u32 %s907_s26, 4  ;;  %s908_s28 = smov 128   ;;  %s22_s27 = int_to_ptr.vmem [resolvable:$true] %s21_s27 }
   0x7   :  { %s909_s29 = smov 8   ;;  %s43_s6 = sshll.u32 %s1188_s2, 4  ;;  %s44_s6 = int_to_ptr.hbm [resolvable:$true] %s43_s6 }
   0x8   :  { %27 = dma.hbm_to_vmem [thread:$0]  %s20_s25, 256, %s22_s27, [#allocation4], %s908_s28, %s908_s28, %s909_s29  }
   0x9   :  { %s910_s7 = smov [#allocation8]   ;;  %s56_s10 = sshll.u32 %s1189_s3, 4  ;;  %s57_s10 = int_to_ptr.hbm [resolvable:$true] %s56_s10 }
   0xa   :  { %s45_s8 = sshll.u32 %s910_s7, 4  ;;  %s911_s11 = smov 64   ;;  %s46_s8 = int_to_ptr.vmem [resolvable:$true] %s45_s8 }
   0xb   :  { %s912_s12 = smov 4   ;;  %s913_s13 = smov [#allocation9]  }
   0xc   :  { %51 = dma.hbm_to_vmem [thread:$0]  %s44_s6, 256, %s46_s8, [#allocation7], %s911_s11, %s911_s11, %s912_s12  }
   0xd   :  { %s58_s14 = sshll.u32 %s913_s13, 4  ;;  %s59_s14 = int_to_ptr.vmem [resolvable:$true] %s58_s14 }
   0xe   :  { %64 = dma.hbm_to_vmem [thread:$0]  %s57_s10, 256, %s59_s14, [#allocation10], %s911_s11, %s911_s11, %s912_s12  }
   0xf   :  { %898 = dma.done.wait [#allocation4], 256  }
  0x10   :  { %899 = vsyncadd [#allocation4], 4294967040 }
  0x11   :  { %900 = dma.done.wait [#allocation7], 384  }
  0x12   :  { %901 = vsyncadd [#allocation7], 4294966912 }
  0x13   :  { %902 = dma.done.wait [#allocation10], 256  }
  0x14   :  { %903 = vsyncadd [#allocation10], 4294967040  ;;  %vm87_vm0 = vcmask 261120   ;;  %v84_v0 = vld [vmem:[#allocation3] sm:$0xff]  ;;  %v969_v3 = vld [vmem:[#allocation3 + $0x8] sm:$0xff]  ;;  %v914_v8 = vmov 32.0  }
  0x15   :  { %v88_v1 = vsel %vm87_vm0, %v84_v0, 0.0  ;;  %v103_v2 = vmul.f32 %v84_v0, %v84_v0  ;;  %v104_v5 = vmul.f32 %v969_v3, %v969_v3  ;;  %v91_v6 = vsel %vm87_vm0, %v969_v3, 0.0  ;;  %v732_v18 = vld [vmem:[#allocation8 + $0x8] sm:$0xff]  ;;  %v731_v21 = vld [vmem:[#allocation8] sm:$0xff]  ;;  %v983_v42 = vld [vmem:[#allocation6] sm:$0xff]  ;;  %s688_s18 = sshll.u32 %s1191_s5, 4  ;;  %s689_s18 = int_to_ptr.hbm [resolvable:$true] %s688_s18 }
  0x16   :  { %89 = vadd.xlane.f32.xlu0 %v88_v1  ;;  %752 = vrcp.f32 %v914_v8  ;;  %176 = vmatpush.bf16.msra.mxu0 %v732_v18  ;;  %v143_v46 = vperm.slane %v983_v42, 0  ;;  %v146_v52 = vperm.slane %v983_v42, 1  ;;  %v154_v57 = vperm.slane %v983_v42, 2 }
  0x17   :  { %v105_v4 = vsel %vm87_vm0, %v103_v2, 0.0  ;;  %v108_v7 = vsel %vm87_vm0, %v104_v5, 0.0 }
  0x18   :  { %106 = vadd.xlane.f32.xlu1 %v105_v4 }
  0x1a   :  { %177 = vmatpush.bf16.msra.mxu0 %v731_v21 }
  0x1c   :  { %v753_v9 = vpop.eup %752 }
  0x1d   :  { %v95_v10 = vmul.f32 32.0, %v753_v9  ;;  %vm99_vm1 = vweird.f32 %v753_v9 }
  0x1e   :  { %92 = vadd.xlane.f32.xlu0 %v91_v6 }
  0x1f   :  { %v96_v11 = vsub.f32 1.0, %v95_v10 }
  0x20   :  { %109 = vadd.xlane.f32.xlu1 %v108_v7 }
  0x21   :  { %v97_v12 = vmul.f32 %v753_v9, %v96_v11 }
  0x23   :  { %v98_v13 = vadd.f32 %v753_v9, %v97_v12 }
  0x25   :  { %v977_v14 = vsel %vm99_vm1, %v753_v9, %v98_v13 }
  0x89   :  { %v90_v15 = vpop.xlane.xlu0 %89 }
  0x8a   :  { %v101_v16 = vmul.f32 %v977_v14, %v90_v15 }
  0x8b   :  { %v107_v17 = vpop.xlane.xlu1 %106 }
  0x8c   :  { %v113_v19 = vmul.f32 %v101_v16, %v101_v16  ;;  %v111_v20 = vmul.f32 %v107_v17, %v977_v14  ;;  %v117_v43 = vsub.f32 %v84_v0, %v101_v16 }
  0x8e   :  { %v115_v22 = vsub.f32 %v111_v20, %v113_v19 }
  0x90   :  { %v119_v23 = vadd.f32 1e-05, %v115_v22 }
  0x91   :  { %v93_v24 = vpop.xlane.xlu0 %92 }
  0x92   :  { %754 = vrsqrt.f32 %v119_v23  ;;  %v102_v25 = vmul.f32 %v977_v14, %v93_v24  ;;  %vm127_vm3 = vweird.f32 %v119_v23 }
  0x93   :  { %v110_v26 = vpop.xlane.xlu1 %109 }
  0x94   :  { %v114_v27 = vmul.f32 %v102_v25, %v102_v25  ;;  %v112_v28 = vmul.f32 %v110_v26, %v977_v14  ;;  %v118_v48 = vsub.f32 %v969_v3, %v102_v25 }
  0x96   :  { %v116_v29 = vsub.f32 %v112_v28, %v114_v27 }
  0x98   :  { %v755_v30 = vpop.eup %754  ;;  %v120_v31 = vadd.f32 1e-05, %v116_v29 }
  0x99   :  { %v122_v32 = vmul.f32 %v755_v30, %v119_v23  ;;  %vm128_vm2 = vweird.f32 %v755_v30 }
  0x9a   :  { %756 = vrsqrt.f32 %v120_v31  ;;  %vm129_vm4 = vmor %vm127_vm3, %vm128_vm2  ;;  %vm137_vm6 = vweird.f32 %v120_v31 }
  0x9b   :  { %v123_v33 = vmul.f32 %v755_v30, %v122_v32 }
  0x9d   :  { %v124_v34 = vmul.f32 0.5, %v123_v33 }
  0x9f   :  { %v125_v35 = vsub.f32 1.5, %v124_v34 }
  0xa0   :  { %v757_v36 = vpop.eup %756 }
  0xa1   :  { %v126_v37 = vmul.f32 %v755_v30, %v125_v35  ;;  %v132_v38 = vmul.f32 %v757_v36, %v120_v31  ;;  %vm138_vm5 = vweird.f32 %v757_v36 }
  0xa2   :  { %vm139_vm7 = vmor %vm137_vm6, %vm138_vm5 }
  0xa3   :  { %v133_v39 = vmul.f32 %v757_v36, %v132_v38  ;;  %v130_v40 = vsel %vm129_vm4, %v755_v30, %v126_v37 }
  0xa4   :  { %v141_v45 = vmul.f32 %v130_v40, %v117_v43 }
  0xa5   :  { %v134_v41 = vmul.f32 0.5, %v133_v39 }
  0xa6   :  { %v144_v51 = vmul.f32 %v143_v46, %v141_v45  ;;  %v915_v45 = vmov 683565275  }
  0xa7   :  { %v135_v44 = vsub.f32 1.5, %v134_v41 }
  0xa8   :  { %v147_v54 = vadd.f32 %v146_v52, %v144_v51  ;;  %v917_v51 = vmov 2131351028  }
  0xa9   :  { %v136_v47 = vmul.f32 %v757_v36, %v135_v44 }
  0xab   :  { %v140_v49 = vsel %vm139_vm7, %v757_v36, %v136_v47  ;;  %v916_v47 = vmov 2475754826  }
  0xac   :  { %v142_v50 = vmul.f32 %v140_v49, %v118_v48 }
  0xae   :  { %v145_v53 = vmul.f32 %v143_v46, %v142_v50 }
  0xb0   :  { %v148_v55 = vadd.f32 %v146_v52, %v145_v53 }
  0xb2   :  { %v153_v56 = vpack.c.bf16 %v148_v55, %v147_v54  ;;  %v918_v54 = vmov 2102212464  }
  0xb4   :  { %711 = vmatmul.msk.bf16.vlgmr.msra.gmra.mxu0 %vm87_vm0, %v153_v56 }
 0x131   :  { %v179_v58 = vpop.f32.mrf.mxu0 }
 0x132   :  { %v990_v59 = vadd.f32 %v179_v58, %v154_v57 }
 0x134   :  { %v712_v60 = vmul.f32 -1.442695, %v990_v59 }
 0x136   :  { %758 = vpow2.f32 %v712_v60 }
 0x139   :  { %v181_v61 = vpop.f32.mrf.mxu0 }
 0x13a   :  { %v993_v62 = vadd.f32 %v181_v61, %v154_v57  ;;  %v919_v57 = vmov 920167782   ;;  %v920_v61 = vmov 1326507024  }
 0x13c   :  { %v759_v63 = vpop.eup %758  ;;  %v713_v0 = vmul.f32 -1.442695, %v993_v62 }
 0x13d   :  { %v190_v1 = vadd.f32 1.0, %v759_v63 }
 0x13e   :  { %760 = vpow2.f32 %v713_v0 }
 0x13f   :  { %762 = vrcp.f32 %v190_v1  ;;  %v203_v7 = vand.u32 2147483648, %v190_v1  ;;  %v201_v9 = vand.u32 2147483647, %v190_v1  ;;  %vm197_vm9 = vweird.f32 %v190_v1 }
 0x141   :  { %v204_v12 = vor.u32 1.1754944e-38, %v203_v7  ;;  %vm202_vm11 = vcmp.eq.f32.partialorder %v201_v9, 8.507059e+37 }
 0x144   :  { %v761_v2 = vpop.eup %760 }
 0x145   :  { %v763_v3 = vpop.eup %762  ;;  %v191_v4 = vadd.f32 1.0, %v761_v2 }
 0x146   :  { %v193_v5 = vmul.f32 %v763_v3, %v190_v1  ;;  %vm198_vm8 = vweird.f32 %v763_v3 }
 0x147   :  { %764 = vrcp.f32 %v191_v4  ;;  %vm199_vm10 = vmor %vm197_vm9, %vm198_vm8  ;;  %v218_v21 = vand.u32 2147483648, %v191_v4  ;;  %v216_v23 = vand.u32 2147483647, %v191_v4  ;;  %vm212_vm13 = vweird.f32 %v191_v4 }
 0x148   :  { %v194_v6 = vsub.f32 1.0, %v193_v5 }
 0x149   :  { %v219_v29 = vor.u32 1.1754944e-38, %v218_v21  ;;  %vm217_vm15 = vcmp.eq.f32.partialorder %v216_v23, 8.507059e+37 }
 0x14a   :  { %v195_v8 = vmul.f32 %v763_v3, %v194_v6 }
 0x14c   :  { %v196_v10 = vadd.f32 %v763_v3, %v195_v8 }
 0x14d   :  { %v765_v11 = vpop.eup %764 }
 0x14e   :  { %v200_v13 = vsel %vm199_vm10, %v763_v3, %v196_v10  ;;  %v208_v15 = vmul.f32 %v765_v11, %v191_v4  ;;  %vm213_vm12 = vweird.f32 %v765_v11 }
 0x14f   :  { %v205_v16 = vsel %vm202_vm11, %v204_v12, %v200_v13  ;;  %vm214_vm14 = vmor %vm212_vm13, %vm213_vm12 }
 0x150   :  { %v996_v17 = vmul.f32 1.5707964, %v205_v16  ;;  %v209_v18 = vsub.f32 1.0, %v208_v15 }
 0x152   :  { %v224_v19 = vand.u32 2147483647, %v996_v17  ;;  %v227_v20 = vand.u32 2139095040, %v996_v17  ;;  %v210_v22 = vmul.f32 %v765_v11, %v209_v18 }
 0x154   :  { %v228_v24 = vshrl.u32 %v227_v20, 23  ;;  %v231_v25 = vand.u32 8388607, %v224_v19  ;;  %v211_v26 = vadd.f32 %v765_v11, %v210_v22 }
 0x156   :  { %v714_v27 = vadd.s32 4294967169, %v228_v24  ;;  %v232_v28 = vor.u32 8388608, %v231_v25  ;;  %v215_v30 = vsel %vm214_vm14, %v765_v11, %v211_v26 }
 0x157   :  { %v220_v32 = vsel %vm217_vm15, %v219_v29, %v215_v30 }
 0x158   :  { %v234_v31 = vadd.s32 1, %v714_v27  ;;  %v1002_v33 = vmul.f32 1.5707964, %v220_v32  ;;  %v1004_v34 = vshll.u32 %v232_v28, 8 }
 0x15a   :  { %vm235_vm1 = vcmp.gt.s32.totalorder %v234_v31, 0  ;;  %v379_v36 = vand.u32 2147483647, %v1002_v33  ;;  %v382_v37 = vand.u32 2139095040, %v1002_v33  ;;  %v273_v40 = vand.u32 65535, %v1004_v34 }
 0x15b   :  { %v236_v35 = vsel %vm235_vm1, %v234_v31, 0  ;;  %v274_v41 = vshrl.u32 %v1004_v34, 16 }
 0x15c   :  { %v238_v38 = vand.u32 31, %v236_v35  ;;  %v383_v43 = vshrl.u32 %v382_v37, 23  ;;  %v237_v44 = vshrl.u32 %v236_v35, 5  ;;  %v1014_v49 = vand.u32 8388607, %v379_v36 }
 0x15e   :  { %v239_v39 = vsub.s32 32, %v238_v38  ;;  %v241_v46 = vshll.u32 %v915_v45, %v238_v38  ;;  %v244_v48 = vshll.u32 %v916_v47, %v238_v38  ;;  %v247_v53 = vshll.u32 %v917_v51, %v238_v38 }
 0x15f   :  { %v250_v56 = vshll.u32 %v918_v54, %v238_v38  ;;  %v253_v60 = vshll.u32 %v919_v57, %v238_v38  ;;  %v717_v3 = vadd.s32 4294967169, %v383_v43  ;;  %vm256_vm2 = vcmp.lt.s32.totalorder %v237_v44, 1 }
 0x160   :  { %v242_v50 = vshrl.u32 %v916_v47, %v239_v39  ;;  %v245_v52 = vshrl.u32 %v917_v51, %v239_v39  ;;  %v248_v55 = vshrl.u32 %v918_v54, %v239_v39  ;;  %v251_v58 = vshrl.u32 %v919_v57, %v239_v39 }
 0x161   :  { %v254_v63 = vshrl.u32 %v920_v61, %v239_v39  ;;  %vm259_vm3 = vcmp.lt.s32.totalorder %v237_v44, 4  ;;  %v240_v6 = vshrl.u32 %v915_v45, %v239_v39  ;;  %vm258_vm4 = vcmp.lt.s32.totalorder %v237_v44, 3 }
 0x162   :  { %v243_v0 = vor.u32 %v242_v50, %v241_v46  ;;  %v246_v1 = vor.u32 %v245_v52, %v244_v48  ;;  %v249_v2 = vor.u32 %v248_v55, %v247_v53  ;;  %v252_v4 = vor.u32 %v251_v58, %v250_v56 }
 0x163   :  { %v255_v5 = vor.u32 %v254_v63, %v253_v60  ;;  %v389_v12 = vadd.s32 1, %v717_v3  ;;  %vm257_vm5 = vcmp.lt.s32.totalorder %v237_v44, 2  ;;  %v387_v26 = vor.u32 8388608, %v1014_v49 }
 0x164   :  { %v261_v7 = vsel %vm259_vm3, %v249_v2, 2102212464  ;;  %v264_v8 = vsel %vm256_vm2, %v243_v0, %v246_v1  ;;  %v268_v9 = vsel %vm256_vm2, %v246_v1, %v249_v2  ;;  %v265_v10 = vsel %vm259_vm3, %v252_v4, 920167782 }
 0x165   :  { %v269_v11 = vsel %vm259_vm3, %v255_v5, 1326507024  ;;  %v260_v13 = vsel %vm256_vm2, %v240_v6, %v243_v0  ;;  %v266_v15 = vsel %vm258_vm4, %v249_v2, %v265_v10  ;;  %v262_v18 = vsel %vm258_vm4, %v246_v1, %v261_v7 }
 0x166   :  { %v270_v16 = vsel %vm258_vm4, %v252_v4, %v269_v11  ;;  %v267_v20 = vsel %vm257_vm5, %v264_v8, %v266_v15  ;;  %vm390_vm6 = vcmp.gt.s32.totalorder %v389_v12, 0  ;;  %v1026_v27 = vsel %vm257_vm5, %v260_v13, %v262_v18 }
 0x167   :  { %v271_v21 = vsel %vm257_vm5, %v268_v9, %v270_v16  ;;  %v297_v24 = vand.u32 65535, %v267_v20  ;;  %v298_v25 = vshrl.u32 %v267_v20, 16  ;;  %v391_v30 = vsel %vm390_vm6, %v389_v12, 0 }
 0x168   :  { %v275_v22 = vand.u32 65535, %v271_v21  ;;  %v276_v23 = vshrl.u32 %v271_v21, 16  ;;  %v393_v55 = vand.u32 31, %v391_v30  ;;  %v921_v56 = vmov 0  }
 0x169   :  { %v300_v35 = vmul.u32 %v298_v25, %v273_v40  ;;  %v301_v37 = vmul.u32 %v297_v24, %v274_v41  ;;  %v299_v43 = vmul.u32 %v297_v24, %v273_v40  ;;  %v302_v44 = vmul.u32 %v298_v25, %v274_v41 }
 0x16a   :  { %v278_v28 = vmul.u32 %v276_v23, %v273_v40  ;;  %v279_v29 = vmul.u32 %v275_v22, %v274_v41  ;;  %v277_v31 = vmul.u32 %v275_v22, %v273_v40  ;;  %v280_v32 = vmul.u32 %v276_v23, %v274_v41 }
 0x16b   :  { %v303_v50 = vshll.u32 %v300_v35, 16  ;;  %v304_v52 = vshrl.u32 %v300_v35, 16  ;;  %v305_v49 = vshll.u32 %v301_v37, 16  ;;  %v306_v60 = vshrl.u32 %v301_v37, 16 }
 0x16c   :  { %v281_v38 = vshll.u32 %v278_v28, 16  ;;  %v282_v39 = vshrl.u32 %v278_v28, 16  ;;  %v283_v46 = vshll.u32 %v279_v29, 16  ;;  %v284_v48 = vshrl.u32 %v279_v29, 16 }
 0x16d   :  { %vm307_vm8 = vc.u32 %v299_v43, %v303_v50  ;;  %v309_v63 = vadd.s32 %v303_v50, %v299_v43  ;;  %v1030_v40 = vsub.s32 32, %v393_v55  ;;  %v1033_v3 = vshrl.u32 %v391_v30, 5 }
 0x16e   :  { %vm285_vm7 = vc.u32 %v277_v31, %v281_v38  ;;  %v287_v53 = vadd.s32 %v281_v38, %v277_v31  ;;  %v308_v1 = vsel %vm307_vm8, 1, %v921_v56  ;;  %v396_v7 = vshll.u32 %v915_v45, %v393_v55 }
 0x16f   :  { %v286_v58 = vsel %vm285_vm7, 1, %v921_v56  ;;  %v310_v2 = vadd.s32 %v308_v1, %v302_v44  ;;  %vm311_vm10 = vc.u32 %v309_v63, %v305_v49  ;;  %v1036_v6 = vadd.s32 %v309_v63, %v305_v49 }
 0x170   :  { %v288_v0 = vadd.s32 %v286_v58, %v280_v32  ;;  %vm289_vm9 = vc.u32 %v287_v53, %v283_v46  ;;  %v312_v5 = vsel %vm311_vm10, 1, %v921_v56  ;;  %v397_v9 = vshrl.u32 %v916_v47, %v1030_v40 }
 0x171   :  { %v290_v41 = vsel %vm289_vm9, 1, %v921_v56  ;;  %v314_v8 = vadd.s32 %v312_v5, %v310_v2  ;;  %v399_v10 = vshll.u32 %v916_v47, %v393_v55  ;;  %v400_v11 = vshrl.u32 %v917_v51, %v1030_v40 }
 0x172   :  { %v292_v4 = vadd.s32 %v290_v41, %v288_v0  ;;  %v402_v13 = vshll.u32 %v917_v51, %v393_v55  ;;  %v403_v15 = vshrl.u32 %v918_v54, %v1030_v40  ;;  %v405_v16 = vshll.u32 %v918_v54, %v393_v55 }
 0x173   :  { %v315_v18 = vadd.s32 %v314_v8, %v304_v52  ;;  %v1048_v20 = vor.u32 %v397_v9, %v396_v7  ;;  %v1050_v21 = vor.u32 %v400_v11, %v399_v10  ;;  %v406_v22 = vshrl.u32 %v919_v57, %v1030_v40 }
 0x174   :  { %v293_v12 = vadd.s32 %v292_v4, %v282_v39  ;;  %v404_v23 = vor.u32 %v403_v15, %v402_v13  ;;  %v408_v24 = vshll.u32 %v919_v57, %v393_v55  ;;  %v409_v51 = vshrl.u32 %v920_v61, %v1030_v40 }
 0x175   :  { %v316_v25 = vadd.s32 %v315_v18, %v306_v60  ;;  %v407_v28 = vor.u32 %v406_v22, %v405_v16  ;;  %vm411_vm12 = vcmp.lt.s32.totalorder %v1033_v3, 1  ;;  %v1062_v29 = vshll.u32 %v387_v26, 8 }
 0x176   :  { %v1054_v47 = vadd.s32 %v293_v12, %v284_v48  ;;  %v410_v54 = vor.u32 %v409_v51, %v408_v24  ;;  %v317_v30 = vmul.u32 %v1004_v34, %v1026_v27  ;;  %vm414_vm13 = vcmp.lt.s32.totalorder %v1033_v3, 4 }
 0x177   :  { %v320_v31 = vadd.s32 1, %v316_v25  ;;  %v419_v57 = vsel %vm411_vm12, %v1048_v20, %v1050_v21  ;;  %vm413_vm14 = vcmp.lt.s32.totalorder %v1033_v3, 3  ;;  %v420_v61 = vsel %vm414_vm13, %v407_v28, 920167782 }
 0x178   :  { %vm319_vm11 = vc.u32 %v1054_v47, %v1036_v6  ;;  %v423_v26 = vsel %vm411_vm12, %v1050_v21, %v404_v23  ;;  %v424_v34 = vsel %vm414_vm13, %v410_v54, 1326507024  ;;  %vm412_vm15 = vcmp.lt.s32.totalorder %v1033_v3, 2 }
 0x179   :  { %v321_v27 = vsel %vm319_vm11, %v320_v31, %v316_v25  ;;  %v421_v32 = vsel %vm413_vm14, %v404_v23, %v420_v61  ;;  %v425_v35 = vsel %vm413_vm14, %v407_v28, %v424_v34  ;;  %v428_v43 = vand.u32 65535, %v1062_v29 }
 0x17a   :  { %v322_v37 = vadd.s32 %v321_v27, %v317_v30  ;;  %v422_v38 = vsel %vm412_vm15, %v419_v57, %v421_v32  ;;  %v426_v39 = vsel %vm412_vm15, %v423_v26, %v425_v35  ;;  %v429_v44 = vshrl.u32 %v1062_v29, 16 }
 0x17b   :  { %v430_v46 = vand.u32 65535, %v426_v39  ;;  %v431_v48 = vshrl.u32 %v426_v39, 16  ;;  %v453_v50 = vshrl.u32 %v422_v38, 16  ;;  %v452_v53 = vand.u32 65535, %v422_v38 }
 0x17c   :  { %v323_v52 = vadd.s32 536870912, %v322_v37  ;;  %v416_v30 = vsel %vm414_vm13, %v404_v23, 2102212464  ;;  %v395_v57 = vshrl.u32 %v915_v45, %v1030_v40  ;;  %v318_v45 = vadd.s32 %v1036_v6, %v1054_v47 }
 0x17d   :  { %v433_v49 = vmul.u32 %v431_v48, %v428_v43  ;;  %v434_v55 = vmul.u32 %v430_v46, %v429_v44  ;;  %v455_v60 = vmul.u32 %v453_v50, %v428_v43  ;;  %v432_v63 = vmul.u32 %v430_v46, %v428_v43 }
 0x17e   :  { %v1090_v58 = vshrl.u32 %v323_v52, 30  ;;  %v435_v41 = vmul.u32 %v431_v48, %v429_v44  ;;  %v454_v2 = vmul.u32 %v452_v53, %v428_v43  ;;  %v456_v8 = vmul.u32 %v452_v53, %v429_v44 }
 0x17f   :  { %v436_v0 = vshll.u32 %v433_v49, 16  ;;  %v458_v4 = vshll.u32 %v455_v60, 16  ;;  %v438_v5 = vshll.u32 %v434_v55, 16  ;;  %v437_v11 = vshrl.u32 %v433_v49, 16 }
 0x180   :  { %v325_v1 = vshll.u32 %v1090_v58, 30  ;;  %v457_v16 = vmul.u32 %v453_v50, %v429_v44  ;;  %v460_v22 = vshll.u32 %v456_v8, 16  ;;  %v439_v61 = vshrl.u32 %v434_v55, 16 }
 0x181   :  { %vm440_vm1 = vc.u32 %v432_v63, %v436_v0  ;;  %v442_v7 = vadd.s32 %v436_v0, %v432_v63  ;;  %vm462_vm3 = vc.u32 %v454_v2, %v458_v4  ;;  %v464_v51 = vadd.s32 %v458_v4, %v454_v2 }
 0x182   :  { %v326_v9 = vsub.s32 %v322_v37, %v325_v1  ;;  %v441_v10 = vsel %vm440_vm1, 1, %v921_v56  ;;  %v463_v24 = vsel %vm462_vm3, 1, %v921_v56  ;;  %v459_v27 = vshrl.u32 %v455_v60, 16 }
 0x183   :  { %v443_v12 = vadd.s32 %v441_v10, %v435_v41  ;;  %vm444_vm2 = vc.u32 %v442_v7, %v438_v5  ;;  %v465_v28 = vadd.s32 %v463_v24, %v457_v16  ;;  %vm466_vm5 = vc.u32 %v464_v51, %v460_v22 }
 0x184   :  { %vm327_vm4 = vcmp.lt.s32.totalorder %v326_v9, 0  ;;  %v328_v13 = vsub.s32 0, %v326_v9  ;;  %v445_v15 = vsel %vm444_vm2, 1, %v921_v56  ;;  %v467_v26 = vsel %vm466_vm5, 1, %v921_v56 }
 0x185   :  { %v447_v18 = vadd.s32 %v445_v15, %v443_v12  ;;  %v469_v32 = vadd.s32 %v467_v26, %v465_v28  ;;  %v415_v35 = vsel %vm411_vm12, %v395_v57, %v1048_v20  ;;  %v417_v37 = vsel %vm413_vm14, %v1050_v21, %v416_v30  ;;  %v733_v26 = vld [vmem:[#allocation9] sm:$0xff] }
 0x186   :  { %v329_v25 = vsel %vm327_vm4, %v328_v13, %v326_v9  ;;  %v461_v38 = vshrl.u32 %v456_v8, 16  ;;  %v468_v56 = vadd.s32 %v464_v51, %v460_v22  ;;  %v418_v46 = vsel %vm412_vm15, %v415_v35, %v417_v37  ;;  %v734_v51 = vld [vmem:[#allocation9 + $0x8] sm:$0xff] }
 0x187   :  { %v330_v54 = vclz %v329_v25  ;;  %v448_v31 = vadd.s32 %v447_v18, %v437_v11  ;;  %v470_v39 = vadd.s32 %v469_v32, %v459_v27  ;;  %v472_v53 = vmul.u32 %v1062_v29, %v418_v46  ;;  %563 = vmatpush.bf16.msra.mxu1 %v734_v51 }
 0x188   :  { %vm226_vm8 = vcmp.lt.s32.totalorder %v996_v17, 0  ;;  %vm1115_vm9 = vcmp.le.f32.partialorder %v224_v19, 0.7853982  ;;  %vm381_vm12 = vcmp.lt.s32.totalorder %v1002_v33, 0  ;;  %vm1131_vm13 = vcmp.le.f32.partialorder %v379_v36, 0.7853982 }
 0x189   :  { %v715_v34 = vadd.s32 4294967294, %v330_v54  ;;  %v449_v23 = vadd.s32 %v448_v31, %v439_v61  ;;  %v471_v48 = vadd.s32 %v470_v39, %v461_v38  ;;  %vm367_vm2 = vweird.f32 %v996_v17 }
 0x18b   :  { %vm716_vm6 = vcmp.lt.s32.totalorder %v715_v34, 0  ;;  %vm474_vm7 = vc.u32 %v449_v23, %v468_v56  ;;  %v475_v21 = vadd.s32 1, %v471_v48  ;;  %v473_v19 = vadd.s32 %v468_v56, %v449_v23  ;;  %564 = vmatpush.bf16.msra.mxu1 %v733_v26 }
 0x18c   :  { %v333_v40 = vsel %vm716_vm6, 0, %v715_v34  ;;  %v348_v23 = vsub.s32 4, %v1090_v58  ;;  %vm522_vm6 = vweird.f32 %v1002_v33 }
 0x18d   :  { %v334_v43 = vsub.s32 32, %v333_v40  ;;  %v338_v44 = vsub.s32 4294967266, %v333_v40  ;;  %v335_v20 = vshll.u32 %v326_v9, %v333_v40  ;;  %v476_v60 = vsel %vm474_vm7, %v475_v21, %v471_v48 }
 0x18e   :  { %v477_v63 = vadd.s32 %v476_v60, %v472_v53  ;;  %v349_v56 = vsel %vm226_vm8, %v348_v23, %v1090_v58 }
 0x18f   :  { %v336_v50 = vshrl.u32 %v318_v45, %v334_v43  ;;  %v339_v52 = vadd.s32 127, %v338_v44 }
 0x190   :  { %v478_v47 = vadd.s32 536870912, %v477_v63 }
 0x191   :  { %v337_v49 = vor.u32 %v336_v50, %v335_v20  ;;  %v340_v55 = vshll.u32 %v339_v52, 23  ;;  %v351_v50 = vsel %vm1115_vm9, 0, %v349_v56 }
 0x192   :  { %v479_v41 = vshrl.u32 %v478_v47, 30 }
 0x193   :  { %v341_v6 = vor.u32 4788187, %v340_v55  ;;  %v344_v1 = vcvt.s32.f32 %v337_v49  ;;  %v368_v55 = vadd.s32 3, %v351_v50 }
 0x194   :  { %v480_v3 = vshll.u32 %v479_v41, 30  ;;  %v503_v48 = vsub.s32 4, %v479_v41 }
 0x195   :  { %v342_v0 = vand.u32 2147483647, %v341_v6 }
 0x196   :  { %v481_v5 = vsub.s32 %v477_v63, %v480_v3  ;;  %v504_v60 = vsel %vm381_vm12, %v503_v48, %v479_v41  ;;  %v369_v3 = vand.u32 3, %v368_v55 }
 0x197   :  { %v345_v2 = vmul.f32 %v344_v1, %v342_v0  ;;  %v506_v0 = vsel %vm1131_vm13, 0, %v504_v60 }
 0x198   :  { %vm482_vm10 = vcmp.lt.s32.totalorder %v481_v5, 0  ;;  %v483_v9 = vsub.s32 0, %v481_v5  ;;  %vm371_vm14 = vcmp.eq.s32.totalorder %v369_v3, 0  ;;  %vm374_vm15 = vcmp.eq.s32.totalorder %v369_v3, 2 }
 0x199   :  { %v346_v4 = vxor.u32 2147483648, %v345_v2  ;;  %vm370_vm1 = vcmp.lt.s32.totalorder %v369_v3, 2  ;;  %v622_v3 = vperm.slane %v983_v42, 5 }
 0x19a   :  { %v484_v11 = vsel %vm482_vm10, %v483_v9, %v481_v5 }
 0x19b   :  { %v347_v29 = vsel %vm226_vm8, %v346_v4, %v345_v2  ;;  %v485_v12 = vclz %v484_v11 }
 0x19c   :  { %v350_v8 = vsel %vm1115_vm9, %v996_v17, %v347_v29  ;;  %v523_v29 = vadd.s32 3, %v506_v0  ;;  %v619_v0 = vperm.slane %v983_v42, 4 }
 0x19d   :  { %v352_v10 = vmul.f32 %v350_v8, %v350_v8  ;;  %v718_v13 = vadd.s32 4294967294, %v485_v12 }
 0x19f   :  { %v360_v15 = vmul.f32 -0.00019511016, %v352_v10  ;;  %vm719_vm11 = vcmp.lt.s32.totalorder %v718_v13, 0  ;;  %v353_v28 = vmul.f32 -0.001358992, %v352_v10 }
 0x1a0   :  { %v488_v16 = vsel %vm719_vm11, 0, %v718_v13  ;;  %v524_v13 = vand.u32 3, %v523_v29 }
 0x1a1   :  { %v489_v18 = vsub.s32 32, %v488_v16  ;;  %v361_v22 = vadd.f32 0.008332121, %v360_v15  ;;  %v493_v24 = vsub.s32 4294967266, %v488_v16  ;;  %v490_v54 = vshll.u32 %v481_v5, %v488_v16 }
 0x1a2   :  { %v354_v34 = vadd.f32 0.041655596, %v353_v28  ;;  %vm526_vm3 = vcmp.eq.s32.totalorder %v524_v13, 0  ;;  %vm529_vm4 = vcmp.eq.s32.totalorder %v524_v13, 2  ;;  %vm525_vm5 = vcmp.lt.s32.totalorder %v524_v13, 2 }
 0x1a3   :  { %v491_v25 = vshrl.u32 %v473_v19, %v489_v18  ;;  %v494_v30 = vadd.s32 127, %v493_v24  ;;  %v362_v31 = vmul.f32 %v361_v22, %v352_v10 }
 0x1a4   :  { %v355_v38 = vmul.f32 %v354_v34, %v352_v10 }
 0x1a5   :  { %v492_v57 = vor.u32 %v491_v25, %v490_v54  ;;  %v495_v61 = vshll.u32 %v494_v30, 23  ;;  %v363_v32 = vadd.f32 -0.16666654, %v362_v31 }
 0x1a6   :  { %v356_v43 = vadd.f32 -0.4999988, %v355_v38 }
 0x1a7   :  { %v496_v27 = vor.u32 4788187, %v495_v61  ;;  %v499_v37 = vcvt.s32.f32 %v492_v57  ;;  %v364_v45 = vmul.f32 %v363_v32, %v352_v10  ;;  %v541_v61 = vperm.slane %v983_v42, 3 }
 0x1a8   :  { %v357_v21 = vmul.f32 %v356_v43, %v352_v10 }
 0x1a9   :  { %v497_v35 = vand.u32 2147483647, %v496_v27  ;;  %v365_v52 = vadd.f32 1.0, %v364_v45 }
 0x1aa   :  { %v358_v47 = vadd.f32 1.0, %v357_v21 }
 0x1ab   :  { %v500_v39 = vmul.f32 %v499_v37, %v497_v35  ;;  %v366_v36 = vmul.f32 %v365_v52, %v350_v8 }
 0x1ac   :  { %v375_v9 = vxor.u32 2147483648, %v358_v47 }
 0x1ad   :  { %v501_v40 = vxor.u32 2147483648, %v500_v39  ;;  %v372_v4 = vxor.u32 2147483648, %v366_v36 }
 0x1ae   :  { %v376_v15 = vsel %vm374_vm15, %v375_v9, %v366_v36 }
 0x1af   :  { %v502_v46 = vsel %vm381_vm12, %v501_v40, %v500_v39  ;;  %v373_v12 = vsel %vm371_vm14, %v358_v47, %v372_v4 }
 0x1b0   :  { %v505_v20 = vsel %vm1131_vm13, %v1002_v33, %v502_v46  ;;  %v377_v18 = vsel %vm370_vm1, %v373_v12, %v376_v15 }
 0x1b1   :  { %v507_v58 = vmul.f32 %v505_v20, %v505_v20  ;;  %v378_v24 = vsel %vm367_vm2, nan, %v377_v18 }
 0x1b2   :  { %v534_v30 = vmul.f32 %v378_v24, %v990_v59 }
 0x1b3   :  { %v508_v53 = vmul.f32 -0.001358992, %v507_v58  ;;  %v515_v49 = vmul.f32 -0.00019511016, %v507_v58 }
 0x1b5   :  { %v509_v63 = vadd.f32 0.041655596, %v508_v53  ;;  %v516_v6 = vadd.f32 0.008332121, %v515_v49 }
 0x1b7   :  { %v510_v1 = vmul.f32 %v509_v63, %v507_v58  ;;  %v517_v2 = vmul.f32 %v516_v6, %v507_v58 }
 0x1b9   :  { %v511_v5 = vadd.f32 -0.4999988, %v510_v1  ;;  %v518_v7 = vadd.f32 -0.16666654, %v517_v2 }
 0x1bb   :  { %v512_v10 = vmul.f32 %v511_v5, %v507_v58  ;;  %v519_v11 = vmul.f32 %v518_v7, %v507_v58  ;;  %v625_v7 = vperm.slane %v983_v42, 6  ;;  %v635_v42 = vstv %s1190_s4  ;;  %s922_s4 = smov [#allocation11]  }
 0x1bc   :  { %s686_s15 = sshll.u32 %s922_s4, 4  ;;  %s687_s15 = int_to_ptr.vmem [resolvable:$true] %s686_s15 }
 0x1bd   :  { %v513_v41 = vadd.f32 1.0, %v512_v10  ;;  %v520_v8 = vadd.f32 1.0, %v519_v11 }
 0x1bf   :  { %v521_v16 = vmul.f32 %v520_v8, %v505_v20  ;;  %v530_v19 = vxor.u32 2147483648, %v513_v41 }
 0x1c1   :  { %v527_v22 = vxor.u32 2147483648, %v521_v16  ;;  %v531_v25 = vsel %vm529_vm4, %v530_v19, %v521_v16 }
 0x1c3   :  { %v528_v51 = vsel %vm526_vm3, %v513_v41, %v527_v22 }
 0x1c4   :  { %v532_v28 = vsel %vm525_vm5, %v528_v51, %v531_v25 }
 0x1c5   :  { %v533_v54 = vsel %vm522_vm6, nan, %v532_v28 }
 0x1c6   :  { %v535_v31 = vmul.f32 %v533_v54, %v993_v62 }
 0x1c8   :  { %v540_v57 = vpack.c.bf16 %v535_v31, %v534_v30 }
 0x1ca   :  { %728 = vmatmul.msk.bf16.vlgmr.msra.gmra.mxu1 %vm87_vm0, %v540_v57 }
 0x247   :  { %v566_v17 = vpop.f32.mrf.mxu1 }
 0x248   :  { %v1148_v26 = vadd.f32 %v566_v17, %v541_v61 }
 0x24a   :  { %v571_v34 = vsel %vm87_vm0, %v1148_v26, 0.0  ;;  %v579_v33 = vmul.f32 %v1148_v26, %v1148_v26 }
 0x24b   :  { %572 = vadd.xlane.f32.xlu2 %v571_v34 }
 0x24c   :  { %v581_v27 = vsel %vm87_vm0, %v579_v33, 0.0 }
 0x24d   :  { %582 = vadd.xlane.f32.xlu0 %v581_v27 }
 0x24f   :  { %v568_v59 = vpop.f32.mrf.mxu1 }
 0x250   :  { %v1155_v62 = vadd.f32 %v568_v59, %v541_v61 }
 0x252   :  { %v574_v32 = vsel %vm87_vm0, %v1155_v62, 0.0  ;;  %v580_v35 = vmul.f32 %v1155_v62, %v1155_v62 }
 0x253   :  { %575 = vadd.xlane.f32.xlu2 %v574_v32 }
 0x254   :  { %v584_v37 = vsel %vm87_vm0, %v580_v35, 0.0 }
 0x255   :  { %585 = vadd.xlane.f32.xlu1 %v584_v37 }
 0x2be   :  { %v573_v23 = vpop.xlane.xlu2 %572 }
 0x2bf   :  { %v577_v38 = vmul.f32 %v573_v23, %v977_v14 }
 0x2c0   :  { %v583_v39 = vpop.xlane.xlu0 %582 }
 0x2c1   :  { %v589_v45 = vmul.f32 %v577_v38, %v577_v38  ;;  %v587_v40 = vmul.f32 %v583_v39, %v977_v14  ;;  %v593_v47 = vsub.f32 %v1148_v26, %v577_v38 }
 0x2c3   :  { %v591_v56 = vsub.f32 %v587_v40, %v589_v45 }
 0x2c5   :  { %v595_v43 = vadd.f32 1e-05, %v591_v56 }
 0x2c6   :  { %v576_v44 = vpop.xlane.xlu2 %575 }
 0x2c7   :  { %766 = vrsqrt.f32 %v595_v43  ;;  %v578_v46 = vmul.f32 %v576_v44, %v977_v14  ;;  %vm603_vm8 = vweird.f32 %v595_v43 }
 0x2c8   :  { %v586_v48 = vpop.xlane.xlu1 %585 }
 0x2c9   :  { %v590_v20 = vmul.f32 %v578_v46, %v578_v46  ;;  %v588_v50 = vmul.f32 %v586_v48, %v977_v14  ;;  %v594_v11 = vsub.f32 %v1155_v62, %v578_v46 }
 0x2cb   :  { %v592_v52 = vsub.f32 %v588_v50, %v590_v20 }
 0x2cd   :  { %v767_v58 = vpop.eup %766  ;;  %v596_v21 = vadd.f32 1e-05, %v592_v52 }
 0x2ce   :  { %v598_v53 = vmul.f32 %v767_v58, %v595_v43  ;;  %vm604_vm7 = vweird.f32 %v767_v58 }
 0x2cf   :  { %768 = vrsqrt.f32 %v596_v21  ;;  %vm605_vm9 = vmor %vm603_vm8, %vm604_vm7  ;;  %vm613_vm11 = vweird.f32 %v596_v21 }
 0x2d0   :  { %v599_v49 = vmul.f32 %v767_v58, %v598_v53 }
 0x2d2   :  { %v600_v55 = vmul.f32 0.5, %v599_v49 }
 0x2d4   :  { %v601_v60 = vsub.f32 1.5, %v600_v55 }
 0x2d5   :  { %v769_v36 = vpop.eup %768 }
 0x2d6   :  { %v602_v63 = vmul.f32 %v767_v58, %v601_v60  ;;  %v608_v6 = vmul.f32 %v769_v36, %v596_v21  ;;  %vm614_vm10 = vweird.f32 %v769_v36 }
 0x2d7   :  { %vm615_vm12 = vmor %vm613_vm11, %vm614_vm10 }
 0x2d8   :  { %v609_v1 = vmul.f32 %v769_v36, %v608_v6  ;;  %v606_v14 = vsel %vm605_vm9, %v767_v58, %v602_v63 }
 0x2d9   :  { %v617_v2 = vmul.f32 %v606_v14, %v593_v47 }
 0x2da   :  { %v610_v4 = vmul.f32 0.5, %v609_v1 }
 0x2db   :  { %v620_v5 = vmul.f32 %v619_v0, %v617_v2 }
 0x2dc   :  { %v611_v29 = vsub.f32 1.5, %v610_v4 }
 0x2dd   :  { %v623_v9 = vadd.f32 %v622_v3, %v620_v5 }
 0x2de   :  { %v612_v10 = vmul.f32 %v769_v36, %v611_v29 }
 0x2df   :  { %v626_v12 = vmul.f32 %v625_v7, %v623_v9 }
 0x2e0   :  { %v616_v41 = vsel %vm615_vm12, %v769_v36, %v612_v10 }
 0x2e1   :  { %v628_v8 = vsel %vm87_vm0, %v626_v12, 0.0  ;;  %v618_v13 = vmul.f32 %v616_v41, %v594_v11 }
 0x2e2   :  { %629 = vadd.xlane.f32.xlu2 %v628_v8 }
 0x2e3   :  { %v621_v15 = vmul.f32 %v619_v0, %v618_v13 }
 0x2e5   :  { %v624_v16 = vadd.f32 %v622_v3, %v621_v15 }
 0x2e7   :  { %v627_v19 = vmul.f32 %v625_v7, %v624_v16 }
 0x2e9   :  { %v631_v18 = vsel %vm87_vm0, %v627_v19, 0.0 }
 0x2ea   :  { %632 = vadd.xlane.f32.xlu0 %v631_v18 }
 0x355   :  { %v630_v22 = vpop.xlane.xlu2 %629 }
 0x356   :  { %v636_v24 = vadd.f32 %v635_v42, %v630_v22 }
 0x358   :  { %v729_v51 = vmul.f32 -1.442695, %v636_v24 }
 0x35a   :  { %770 = vpow2.f32 %v729_v51 }
 0x35d   :  { %v633_v25 = vpop.xlane.xlu0 %632 }
 0x35e   :  { %v637_v28 = vadd.f32 %v635_v42, %v633_v25 }
 0x360   :  { %v771_v54 = vpop.eup %770  ;;  %v730_v30 = vmul.f32 -1.442695, %v637_v28 }
 0x361   :  { %v644_v31 = vadd.f32 1.0, %v771_v54 }
 0x362   :  { %772 = vpow2.f32 %v730_v30 }
 0x363   :  { %774 = vrcp.f32 %v644_v31  ;;  %v657_v27 = vand.u32 2147483648, %v644_v31  ;;  %v655_v32 = vand.u32 2147483647, %v644_v31  ;;  %vm651_vm14 = vweird.f32 %v644_v31 }
 0x365   :  { %v658_v23 = vor.u32 1.1754944e-38, %v657_v27  ;;  %vm656_vm1 = vcmp.eq.f32.partialorder %v655_v32, 8.507059e+37 }
 0x368   :  { %v773_v57 = vpop.eup %772 }
 0x369   :  { %v775_v61 = vpop.eup %774  ;;  %v645_v17 = vadd.f32 1.0, %v773_v57 }
 0x36a   :  { %v647_v34 = vmul.f32 %v775_v61, %v644_v31  ;;  %vm652_vm13 = vweird.f32 %v775_v61 }
 0x36b   :  { %776 = vrcp.f32 %v645_v17  ;;  %vm653_vm15 = vmor %vm651_vm14, %vm652_vm13  ;;  %v672_v43 = vand.u32 2147483648, %v645_v17  ;;  %v670_v46 = vand.u32 2147483647, %v645_v17  ;;  %vm666_vm3 = vweird.f32 %v645_v17 }
 0x36c   :  { %v648_v33 = vsub.f32 1.0, %v647_v34 }
 0x36d   :  { %v673_v50 = vor.u32 1.1754944e-38, %v672_v43  ;;  %vm671_vm5 = vcmp.eq.f32.partialorder %v670_v46, 8.507059e+37 }
 0x36e   :  { %v649_v59 = vmul.f32 %v775_v61, %v648_v33 }
 0x370   :  { %v650_v35 = vadd.f32 %v775_v61, %v649_v59 }
 0x371   :  { %v777_v37 = vpop.eup %776 }
 0x372   :  { %v662_v38 = vmul.f32 %v777_v37, %v645_v17  ;;  %v654_v39 = vsel %vm653_vm15, %v775_v61, %v650_v35  ;;  %vm667_vm2 = vweird.f32 %v777_v37 }
 0x373   :  { %v659_v45 = vsel %vm656_vm1, %v658_v23, %v654_v39  ;;  %vm668_vm4 = vmor %vm666_vm3, %vm667_vm2 }
 0x374   :  { %v663_v40 = vsub.f32 1.0, %v662_v38  ;;  %v676_v56 = vmin.f32 %v659_v45, 1.0 }
 0x376   :  { %v664_v44 = vmul.f32 %v777_v37, %v663_v40  ;;  %v678_v48 = vmul.f32 %v676_v56, %v1148_v26 }
 0x378   :  { %v665_v20 = vadd.f32 %v777_v37, %v664_v44  ;;  %680 = vst.msk [vmem:[#allocation11] sm:$0xff] %vm87_vm0, %v678_v48 }
 0x37a   :  { %v669_v52 = vsel %vm668_vm4, %v777_v37, %v665_v20 }
 0x37b   :  { %v674_v58 = vsel %vm671_vm5, %v673_v50, %v669_v52 }
 0x37c   :  { %v677_v21 = vmin.f32 %v674_v58, 1.0 }
 0x37e   :  { %v679_v53 = vmul.f32 %v677_v21, %v1155_v62 }
 0x380   :  { %681 = vst.msk [vmem:[#allocation11 + $0x8] sm:$0xff] %vm87_vm0, %v679_v53 }
 0x381   :  { %694 = dma.vmem_to_hbm [thread:$0]  %s687_s15, 256, %s689_s18, [#allocation5], %s908_s28, %s908_s28, %s909_s29  }
 0x382   :  { %904 = dma.done.wait [#allocation5], 256  }
 0x383   :  { %905 = vsyncadd [#allocation5], 4294967040 }
 0x384   :  { %699 = vsyncpa [#allocation4], 1 }
 0x385   :  { %700 = vsyncpa [#allocation7], 1 }
 0x386   :  { %701 = vsyncpa [#allocation10], 1 }
 0x387   :  { %702 = vsyncpa [#allocation5], 1 }

</bundles_post_ra>
